<compile_context>
chip_gen: v5e
topology: v5e:2x2
jax: 0.10.0
libtpu: 0.0.40
codegen_flags: <defaults>
</compile_context>

<pallas_src>
import numpy as np
import jax
import jax.numpy as jnp
from jax.experimental import pallas as pl
from jax.experimental.pallas import tpu as pltpu


_LANE = 128
_SUBLANE = 8
_TILE_BYTES = 8 * 1024 * 1024      # ~8 MiB tiles: step overhead <10% of HBM time
_VMEM_LIMIT = 48 * 1024 * 1024     # explicit raise; ~4x tile in flight + headroom


def _copy_kernel(x_ref, o_ref):
    # Identity copy of the current lane-dense tile: VMEM in -> VMEM out.
    o_ref[...] = x_ref[...]


def _round_up(x, m):
    return ((x + m - 1) // m) * m


def _plan_dense_tiling(total, itemsize):
    """Re-block a flat buffer of `total` elements as (rows, cols) with
    cols % 128 == 0, and pick a sublane-aligned row block whose tile stays
    within _TILE_BYTES.  Returns (rows, cols, block_rows) or None if the
    total is not a multiple of 128."""
    for cols in (4096, 2048, 1024, 512, 256, 128):
        if total % cols:
            continue
        rows = total // cols
        # Largest sublane-aligned row block within the tile budget.
        budget_rows = max(_SUBLANE, _TILE_BYTES // (cols * itemsize))
        block_rows = max(_SUBLANE, (budget_rows // _SUBLANE) * _SUBLANE)
        if block_rows >= rows:
            block_rows = rows            # single full-extent block
        if pl.cdiv(rows, block_rows) == 1 and rows >= 2 * _SUBLANE:
            # Give v7x's two TensorCores at least two grid steps to share.
            block_rows = max(_SUBLANE, _round_up((rows + 1) // 2, _SUBLANE))
        return rows, cols, block_rows
    return None


def flat_forward(x):
    """Equivalent of `x.view(x.size(0), -1)` with the copy done in Pallas."""
    n = x.shape[0]
    d = 1
    for s in x.shape[1:]:
        d *= s
    total = n * d
    itemsize = np.dtype(x.dtype).itemsize
    cost = pl.CostEstimate(flops=0, transcendentals=0,
                           bytes_accessed=2 * total * itemsize)

    plan = _plan_dense_tiling(total, itemsize)
    if plan is not None:
        # Preferred path: fully (8, 128)-aligned, lane-dense tiles; each tile
        # covers all columns of the flat slab, so every DMA is one contiguous
        # HBM burst regardless of batch size.
        rows, cols, block_rows = plan
        x2 = x.reshape(rows, cols)  # zero-cost row-major reshape
        out = pl.pallas_call(
            _copy_kernel,
            out_shape=jax.ShapeDtypeStruct((rows, cols), x.dtype),
            grid=(pl.cdiv(rows, block_rows),),
            in_specs=[pl.BlockSpec((block_rows, cols), lambda i: (i, 0))],
            out_specs=pl.BlockSpec((block_rows, cols), lambda i: (i, 0)),
            compiler_params=pltpu.CompilerParams(
                dimension_semantics=("parallel",),
                vmem_limit_bytes=_VMEM_LIMIT),
            cost_estimate=cost,
        )(x2)
        return out.reshape(n, d)  # zero-cost reshape back to (batch, -1)

    # Ragged fallback (total not a multiple of 128): copy the (n, d) view with
    # both block dims bounded so tiles stay within the VMEM budget on every
    # chip; Pallas masks the partial edge blocks.
    x2 = x.reshape(n, d)
    if d <= _LANE:
        block_d = d                                   # full-extent lane dim
    else:
        block_d = min((d // _LANE) * _LANE, 16 * _LANE)  # 128-aligned chunk
    budget_n = max(_SUBLANE, _TILE_BYTES // max(1, block_d * itemsize))
    block_n = max(_SUBLANE, (budget_n // _SUBLANE) * _SUBLANE)
    if block_n >= n:
        block_n = n                                   # full-extent sublane dim
    out = pl.pallas_call(
        _copy_kernel,
        out_shape=jax.ShapeDtypeStruct((n, d), x.dtype),
        grid=(pl.cdiv(n, block_n), pl.cdiv(d, block_d)),
        in_specs=[pl.BlockSpec((block_n, block_d), lambda i, j: (i, j))],
        out_specs=pl.BlockSpec((block_n, block_d), lambda i, j: (i, j)),
        compiler_params=pltpu.CompilerParams(
            dimension_semantics=("parallel", "parallel"),
            vmem_limit_bytes=_VMEM_LIMIT),
        cost_estimate=cost,
    )(x2)
    return out


if __name__ == "__main__":
    key = jax.random.PRNGKey(0)

    # Small NCHW input consistent with a conv feature map: (2, 4, 16, 16).
    x = jax.random.normal(key, (2, 4, 16, 16), dtype=jnp.float32)
    y = jax.block_until_ready(flat_forward(x))
    expected = np.asarray(x).reshape(x.shape[0], -1)
    assert y.shape == (2, 4 * 16 * 16), y.shape
    assert y.dtype == x.dtype
    np.testing.assert_allclose(np.asarray(y), expected, rtol=0, atol=0)

    # Also exercise the ragged fallback (total not a multiple of 128).
    x2 = jax.random.normal(jax.random.PRNGKey(1), (2, 3, 5, 7),
                           dtype=jnp.float32)
    y2 = jax.block_until_ready(flat_forward(x2))
    expected2 = np.asarray(x2).reshape(x2.shape[0], -1)
    assert y2.shape == (2, 3 * 5 * 7), y2.shape
    np.testing.assert_allclose(np.asarray(y2), expected2, rtol=0, atol=0)

    print("KERNEL_OK")
</pallas_src>

<mosaic_0001>
module attributes {stable_mosaic.version = 11 : i64} {
  func.func @_copy_kernel(%arg0: i32, %arg1: memref<1x2048xf32, #tpu.memory_space<vmem>>, %arg2: memref<1x2048xf32, #tpu.memory_space<vmem>>) attributes {dimension_semantics = [#tpu.dimension_semantics<parallel>], iteration_bounds = array<i64: 1>, scalar_prefetch = 0 : i64, scratch_operands = 0 : i64, tpu.core_type = #tpu.core_type<tc>, window_params = [{transform_indices = @transform_0, window_bounds = array<i64: 1, 2048>}, {transform_indices = @transform_1, window_bounds = array<i64: 1, 2048>}]} {
    %c0 = arith.constant 0 : index
    %c0_0 = arith.constant 0 : index
    %0 = vector.load %arg1[%c0, %c0_0] : memref<1x2048xf32, #tpu.memory_space<vmem>>, vector<1x2048xf32>
    %c0_1 = arith.constant 0 : index
    %c0_2 = arith.constant 0 : index
    %1 = vector.load %arg2[%c0_1, %c0_2] : memref<1x2048xf32, #tpu.memory_space<vmem>>, vector<1x2048xf32>
    tpu.vector_store %arg2[%c0_1, %c0_2], %0 {strides = array<i32>} : memref<1x2048xf32, #tpu.memory_space<vmem>>, vector<1x2048xf32>,
    return
  }
  func.func @transform_0(%arg0: i32) -> (i32, i32) {
    %c0_i32 = arith.constant 0 : i32
    %c0_i32_0 = arith.constant 0 : i32
    return %arg0, %c0_i32 : i32, i32
  }
  func.func @transform_1(%arg0: i32) -> (i32, i32) {
    %c0_i32 = arith.constant 0 : i32
    %c0_i32_0 = arith.constant 0 : i32
    return %arg0, %c0_i32 : i32, i32
  }
}

</mosaic_0001>

<bundles_post_ra>
// kernel: tpu_custom_call.1
= control target key start
LH: loop header
LB: loop body
LE: loop exit
PB: predicated region body
PF: predicated region fallthrough
CT: control target
= control target key end

     0   :  { %6 = vsyncpa [#allocation3], 0  ;;  %s116_s0 = inlined_call_operand.hbm [shape: f32[1,2048], index: 0, kind: input, shape index: {}]   ;;  %s117_s1 = inlined_call_operand.hbm [shape: f32[1,2048], index: 1, kind: output, shape index: {}]  }
   0x1   :  { %7 = vsyncpa [#allocation4], 0  ;;  %s13_s8 = sshll.u32 %s116_s0, 4  ;;  %s98_s9 = smov [#allocation2]   ;;  %s14_s8 = int_to_ptr.hbm [resolvable:$true] %s13_s8 }
   0x2   :  { %s15_s10 = sshll.u32 %s98_s9, 4  ;;  %s16_s10 = int_to_ptr.vmem [resolvable:$true] %s15_s10 }
   0x3   :  { %18 = dma.hbm_to_vmem [thread:$0]  %s14_s8, 256, %s16_s10, [#allocation3]  }
   0x4   :  { %94 = dma.done.wait [#allocation3], 256  }
   0x5   :  { %95 = vsyncadd [#allocation3], 4294967040  ;;  %s99_s11 = smov [#allocation5]   ;;  %s34_s15 = sshll.u32 %s117_s1, 4  ;;  %v23_v0 = vld [vmem:[#allocation2] sm:$0xff]  ;;  %v24_v1 = vld [vmem:[#allocation2 + $0x8] sm:$0xff]  ;;  %s35_s15 = int_to_ptr.hbm [resolvable:$true] %s34_s15 }
   0x6   :  { %s32_s12 = sshll.u32 %s99_s11, 4  ;;  %25 = vst [vmem:[#allocation5] sm:$0xff] %v23_v0  ;;  %s33_s12 = int_to_ptr.vmem [resolvable:$true] %s32_s12 }
   0x7   :  { %26 = vst [vmem:[#allocation5 + $0x8] sm:$0xff] %v24_v1 }
   0x8   :  { %37 = dma.vmem_to_hbm [thread:$0]  %s33_s12, 256, %s35_s15, [#allocation4]  }
   0x9   :  { %96 = dma.done.wait [#allocation4], 256  }
   0xa   :  { %97 = vsyncadd [#allocation4], 4294967040 }
   0xb   :  { %42 = vsyncpa [#allocation3], 1 }
   0xc   :  { %43 = vsyncpa [#allocation4], 1 }

</bundles_post_ra>
